<compile_context>
chip_gen: v7x
topology: tpu7x:2x2x1
jax: 0.10.0
libtpu: 0.0.40
codegen_flags: <defaults>
</compile_context>

<pallas_src>
import functools

import jax
import jax.numpy as jnp
from jax.experimental import pallas as pl
from jax.experimental.pallas import tpu as pltpu

TEMPERATURE = 0.1
EPS = 1e-12          # torch F.normalize clamp_min eps
_LANES = 128


def _round_up(x, m):
    return (x + m - 1) // m * m


def _infonce_kernel(q_ref, p_ref, loss_ref, m_ref, l_ref, diag_ref, *,
                    n_valid, n_pad, blk):
    qi = pl.program_id(0)            # q row-tile   ("parallel")
    kj = pl.program_id(1)            # p col-tile   ("arbitrary", streamed)
    nk = pl.num_programs(1)

    # ---- init running softmax stats at the start of each row-tile sweep ----
    @pl.when(kj == 0)
    def _():
        m_ref[...] = jnp.full(m_ref.shape, -jnp.inf, dtype=jnp.float32)
        l_ref[...] = jnp.zeros(l_ref.shape, dtype=jnp.float32)

    # Inputs arrive already L2-normalized with 1/temperature folded into q
    # (done once in the wrapper), so the hot loop is MXU + online softmax only.
    # dot_general contracts the last dims of both operands -> p.T never built.
    s = jax.lax.dot_general(
        q_ref[...], p_ref[...],
        dimension_numbers=(((1,), (1,)), ((), ())),
        preferred_element_type=jnp.float32)          # [blk, blk] f32

    # ---- diagonal (label) logit: extracted from the same MXU tile ----------
    @pl.when(qi == kj)
    def _():
        row = jax.lax.broadcasted_iota(jnp.int32, s.shape, 0)
        col = jax.lax.broadcasted_iota(jnp.int32, s.shape, 1)
        d = jnp.sum(jnp.where(row == col, s, 0.0), axis=-1, keepdims=True)
        diag_ref[...] = jnp.broadcast_to(d, diag_ref.shape)

    # ---- online logsumexp update; m/l are (blk, 128) lane-replicated --------
    def _update(st):
        m_prev = m_ref[...]                                   # (blk, 128)
        m_curr = jnp.max(st, axis=-1, keepdims=True)          # (blk, 1)
        m_next = jnp.maximum(m_prev, m_curr)                  # (blk, 128)
        if blk % _LANES == 0:
            m_b = jnp.tile(m_next, (1, blk // _LANES))        # lane-dense repeat
        else:
            m_b = jnp.max(m_next, axis=-1, keepdims=True)     # small-tile fallback
        p_exp = jnp.exp(st - m_b)                             # (blk, blk)
        l_ref[...] = (jnp.exp(m_prev - m_next) * l_ref[...]
                      + jnp.sum(p_exp, axis=-1, keepdims=True))
        m_ref[...] = m_next

    if n_valid == n_pad:            # static: no padded passage rows at all
        _update(s)
    else:
        # Padding only exists in the final kj tile: gate iota/compare/where
        # there instead of paying ~3*blk^2 VPU ops on every inner step.
        @pl.when(kj < nk - 1)
        def _():
            _update(s)

        @pl.when(kj == nk - 1)
        def _():
            col = jax.lax.broadcasted_iota(jnp.int32, s.shape, 1) + kj * blk
            _update(jnp.where(col < n_valid, s, -jnp.inf))

    # ---- finalize: per-row loss = logsumexp - diagonal logit ----------------
    @pl.when(kj == nk - 1)
    def _():
        loss_ref[...] = (m_ref[...] + jnp.log(l_ref[...])
                         - diag_ref[...]).astype(loss_ref.dtype)


def _l2_normalize(x):
    """x / max(||x||_2, eps) in f32, via rsqrt + clamp (no divide, no NaN at 0)."""
    x = x.astype(jnp.float32)
    inv = jnp.minimum(jax.lax.rsqrt(jnp.sum(x * x, axis=-1, keepdims=True)),
                      1.0 / EPS)
    return x * inv


def info_nce_loss(query_logits, passage_logits, temperature=TEMPERATURE,
                  block=512, mxu_dtype=jnp.bfloat16, reduction="mean"):
    """InfoNCE (CE over in-batch negatives) via a tiled Pallas TPU kernel."""
    n, d = query_logits.shape
    assert passage_logits.shape == (n, d), "query/passage batch must match"

    # ---- one-shot preprocessing (f32): normalize, fold 1/T into q -----------
    qn = _l2_normalize(query_logits) * (1.0 / float(temperature))
    pn = _l2_normalize(passage_logits)

    # ---- tile-size selection -------------------------------------------------
    d_pad = _round_up(d, 128)                 # lane-dense hidden dim
    n_pad8 = _round_up(n, 8)
    blk = min(block, n_pad8)
    # Prefer >= 2 row tiles so the "parallel" qi axis can be sharded across
    # both TensorCores of a v7x megacore even for small/medium batches.
    if blk == n_pad8 and blk >= 16 and (blk // 2) % 8 == 0:
        blk //= 2

    # ---- generation-aware VMEM budget ----------------------------------------
    try:
        vmem_cap = int(pltpu.get_tpu_info().vmem_capacity_bytes)
    except Exception:
        vmem_cap = 64 * 1024 * 1024           # v7x-safe fallback
    budget = int(vmem_cap * 0.85)             # leave compiler headroom
    itemsize = jnp.dtype(mxu_dtype).itemsize

    def _vmem_est(b):
        return (2 * 2 * b * d_pad * itemsize   # q, p tiles, double-buffered
                + 2 * b * _LANES * 4           # output block, double-buffered
                + 3 * b * _LANES * 4           # m / l / diag scratch
                + 3 * b * b * 4                # [blk, blk] f32 temporaries
                + (4 << 20))                   # slack for compiler scratch

    # TODO(synk): for very large hidden sizes (d_pad >= ~4K on v7x), chunk D
    # inside the kernel (two-pass matmul accumulation) instead of only
    # shrinking the row tile.
    while _vmem_est(blk) > budget and blk >= 16 and (blk // 2) % 8 == 0:
        blk //= 2
    vmem_limit = int(min(max(_vmem_est(blk), 32 * 1024 * 1024), budget))

    n_pad = _round_up(n, blk)
    nt = n_pad // blk

    # ---- pad + cast once; streamed operands are mxu_dtype (bf16 by default) --
    q = jnp.pad(qn, ((0, n_pad - n), (0, d_pad - d))).astype(mxu_dtype)
    p = jnp.pad(pn, ((0, n_pad - n), (0, d_pad - d))).astype(mxu_dtype)

    kernel = functools.partial(_infonce_kernel, n_valid=n, n_pad=n_pad, blk=blk)

    out = pl.pallas_call(
        kernel,
        out_shape=jax.ShapeDtypeStruct((n_pad, _LANES), jnp.float32),
        grid=(nt, nt),
        in_specs=[
            pl.BlockSpec((blk, d_pad), lambda qi, kj: (qi, 0)),   # q tile (resident)
            pl.BlockSpec((blk, d_pad), lambda qi, kj: (kj, 0)),   # p tile (streamed)
        ],
        out_specs=pl.BlockSpec((blk, _LANES), lambda qi, kj: (qi, 0)),
        scratch_shapes=[
            pltpu.VMEM((blk, _LANES), jnp.float32),   # running row max
            pltpu.VMEM((blk, _LANES), jnp.float32),   # running exp-sum
            pltpu.VMEM((blk, _LANES), jnp.float32),   # diagonal logits
        ],
        compiler_params=pltpu.CompilerParams(
            dimension_semantics=("parallel", "arbitrary"),
            vmem_limit_bytes=vmem_limit),
    )(q, p)

    per_row = out[:n, 0]                       # lane-replicated -> take lane 0
    if reduction == "mean":
        return jnp.sum(per_row) / n
    if reduction == "sum":
        return jnp.sum(per_row)
    return per_row


def info_nce_ref(query_logits, passage_logits, temperature=TEMPERATURE):
    """Pure-JAX reference (full-precision matmul) for sanity checking."""
    q = query_logits / jnp.maximum(
        jnp.linalg.norm(query_logits, axis=-1, keepdims=True), EPS)
    p = passage_logits / jnp.maximum(
        jnp.linalg.norm(passage_logits, axis=-1, keepdims=True), EPS)
    logits = jnp.dot(q, p.T, precision=jax.lax.Precision.HIGHEST) / temperature
    n = query_logits.shape[0]
    lse = jax.scipy.special.logsumexp(logits, axis=-1)
    return jnp.mean(lse - logits[jnp.arange(n), jnp.arange(n)])


if __name__ == "__main__":
    kq, kp, kq2, kp2, kq3, kp3 = jax.random.split(jax.random.PRNGKey(0), 6)

    # 1) small, module-consistent shapes; f32 MXU path -> tight check.
    batch, hidden = 8, 32
    query = jax.random.normal(kq, (batch, hidden), dtype=jnp.float32)
    passage = jax.random.normal(kp, (batch, hidden), dtype=jnp.float32)
    ref = info_nce_ref(query, passage)
    loss_f32 = info_nce_loss(query, passage, mxu_dtype=jnp.float32)
    jax.block_until_ready(loss_f32)
    assert jnp.allclose(loss_f32, ref, atol=5e-3, rtol=5e-3), (loss_f32, ref)

    # 2) default bf16 streaming (the perf path) -> looser check.
    loss_bf16 = info_nce_loss(query, passage)
    jax.block_until_ready(loss_bf16)
    assert jnp.allclose(loss_bf16, ref, atol=3e-2, rtol=3e-2), (loss_bf16, ref)

    # 3) multi-tile path with padded rows/cols: grid (3,3), gated -inf mask.
    n2, d2 = 20, 48
    q2 = jax.random.normal(kq2, (n2, d2), dtype=jnp.float32)
    p2 = jax.random.normal(kp2, (n2, d2), dtype=jnp.float32)
    loss_tiled = info_nce_loss(q2, p2, block=8, mxu_dtype=jnp.float32)
    jax.block_until_ready(loss_tiled)
    ref2 = info_nce_ref(q2, p2)
    assert jnp.allclose(loss_tiled, ref2, atol=5e-3, rtol=5e-3), (loss_tiled, ref2)

    # 4) lane-dense (blk % 128 == 0) + megacore-split path: blk auto-halves
    #    to 128 so nt == 2 row tiles; no padding -> static unmasked branch.
    n3, d3 = 256, 64
    q3 = jax.random.normal(kq3, (n3, d3), dtype=jnp.float32)
    p3 = jax.random.normal(kp3, (n3, d3), dtype=jnp.float32)
    loss_big = info_nce_loss(q3, p3, mxu_dtype=jnp.float32)
    jax.block_until_ready(loss_big)
    ref3 = info_nce_ref(q3, p3)
    assert jnp.allclose(loss_big, ref3, atol=5e-3, rtol=5e-3), (loss_big, ref3)

    print("KERNEL_OK")
</pallas_src>

<mosaic_0001>
module attributes {stable_mosaic.version = 11 : i64} {
  func.func @_infonce_kernel(%arg0: i32, %arg1: i32, %arg2: memref<8x128xf32, #tpu.memory_space<vmem>>, %arg3: memref<8x128xf32, #tpu.memory_space<vmem>>, %arg4: memref<8x128xf32, #tpu.memory_space<vmem>>, %arg5: memref<8x128xf32, #tpu.memory_space<vmem>>, %arg6: memref<8x128xf32, #tpu.memory_space<vmem>>, %arg7: memref<8x128xf32, #tpu.memory_space<vmem>>) attributes {dimension_semantics = [#tpu.dimension_semantics<parallel>, #tpu.dimension_semantics<arbitrary>], iteration_bounds = array<i64: 1, 1>, scalar_prefetch = 0 : i64, scratch_operands = 3 : i64, tpu.core_type = #tpu.core_type<tc>, window_params = [{transform_indices = @transform_0, window_bounds = array<i64: 8, 128>}, {transform_indices = @transform_1, window_bounds = array<i64: 8, 128>}, {transform_indices = @transform_2, window_bounds = array<i64: 8, 128>}]} {
    %c0_i32 = arith.constant 0 : i32
    %0 = arith.cmpi eq, %arg1, %c0_i32 : i32
    %1 = arith.extui %0 : i1 to i32
    %c0_i32_0 = arith.constant 0 : i32
    %2 = arith.cmpi ne, %1, %c0_i32_0 : i32
    scf.if %2 {
      %cst_18 = arith.constant 0xFF800000 : f32
      %32 = vector.broadcast %cst_18 : f32 to vector<8x128xf32>
      %c0_19 = arith.constant 0 : index
      %c0_20 = arith.constant 0 : index
      %33 = vector.load %arg5[%c0_19, %c0_20] : memref<8x128xf32, #tpu.memory_space<vmem>>, vector<8x128xf32>
      tpu.vector_store %arg5[%c0_19, %c0_20], %32 {strides = array<i32>} : memref<8x128xf32, #tpu.memory_space<vmem>>, vector<8x128xf32>,
      %cst_21 = arith.constant 0.000000e+00 : f32
      %34 = vector.broadcast %cst_21 : f32 to vector<8x128xf32>
      %c0_22 = arith.constant 0 : index
      %c0_23 = arith.constant 0 : index
      %35 = vector.load %arg6[%c0_22, %c0_23] : memref<8x128xf32, #tpu.memory_space<vmem>>, vector<8x128xf32>
      tpu.vector_store %arg6[%c0_22, %c0_23], %34 {strides = array<i32>} : memref<8x128xf32, #tpu.memory_space<vmem>>, vector<8x128xf32>,
    } else {
    }
    %c0 = arith.constant 0 : index
    %c0_1 = arith.constant 0 : index
    %3 = vector.load %arg2[%c0, %c0_1] : memref<8x128xf32, #tpu.memory_space<vmem>>, vector<8x128xf32>
    %c0_2 = arith.constant 0 : index
    %c0_3 = arith.constant 0 : index
    %4 = vector.load %arg3[%c0_2, %c0_3] : memref<8x128xf32, #tpu.memory_space<vmem>>, vector<8x128xf32>
    %cst = arith.constant dense<0.000000e+00> : vector<8x8xf32>
    %5 = tpu.matmul %3, %4, %cst {dimension_numbers = #tpu.dot_dimension_numbers<[1], [1], [0], [0], [0, 0, 1, 0], [], []>} : vector<8x128xf32>, vector<8x128xf32>, vector<8x8xf32> -> vector<8x8xf32>
    %6 = arith.cmpi eq, %arg0, %arg1 : i32
    %7 = arith.extui %6 : i1 to i32
    %c0_i32_4 = arith.constant 0 : i32
    %8 = arith.cmpi ne, %7, %c0_i32_4 : i32
    scf.if %8 {
      %32 = tpu.iota {dimensions = array<i32: 0>} : vector<8x8xi32>
      %33 = tpu.iota {dimensions = array<i32: 1>} : vector<8x8xi32>
      %34 = arith.cmpi eq, %32, %33 : vector<8x8xi32>
      %cst_18 = arith.constant 0.000000e+00 : f32
      %35 = vector.broadcast %cst_18 : f32 to vector<8x8xf32>
      %36 = arith.select %34, %5, %35 : vector<8x8xi1>, vector<8x8xf32>
      %cst_19 = arith.constant dense<0.000000e+00> : vector<8xf32>
      %37 = vector.multi_reduction <add>, %36, %cst_19 [1] : vector<8x8xf32> to vector<8xf32>
      %38 = vector.shape_cast %37 : vector<8xf32> to vector<8x1xf32>
      %39 = vector.shape_cast %38 : vector<8x1xf32> to vector<8x1xf32>
      %40 = vector.broadcast %39 : vector<8x1xf32> to vector<8x128xf32>
      %c0_20 = arith.constant 0 : index
      %c0_21 = arith.constant 0 : index
      %41 = vector.load %arg7[%c0_20, %c0_21] : memref<8x128xf32, #tpu.memory_space<vmem>>, vector<8x128xf32>
      tpu.vector_store %arg7[%c0_20, %c0_21], %40 {strides = array<i32>} : memref<8x128xf32, #tpu.memory_space<vmem>>, vector<8x128xf32>,
    } else {
    }
    %c0_5 = arith.constant 0 : index
    %c0_6 = arith.constant 0 : index
    %9 = vector.load %arg5[%c0_5, %c0_6] : memref<8x128xf32, #tpu.memory_space<vmem>>, vector<8x128xf32>
    %cst_7 = arith.constant dense<0xFF800000> : vector<8xf32>
    %10 = vector.multi_reduction <maximumf>, %5, %cst_7 [1] : vector<8x8xf32> to vector<8xf32>
    %11 = vector.shape_cast %10 : vector<8xf32> to vector<8x1xf32>
    %12 = vector.broadcast %11 : vector<8x1xf32> to vector<8x128xf32>
    %13 = arith.maximumf %9, %12 : vector<8x128xf32>
    %cst_8 = arith.constant dense<0xFF800000> : vector<8xf32>
    %14 = vector.multi_reduction <maximumf>, %13, %cst_8 [1] : vector<8x128xf32> to vector<8xf32>
    %15 = vector.shape_cast %14 : vector<8xf32> to vector<8x1xf32>
    %16 = vector.broadcast %15 : vector<8x1xf32> to vector<8x8xf32>
    %17 = arith.subf %5, %16 : vector<8x8xf32>
    %18 = math.exp %17 : vector<8x8xf32>
    %19 = arith.subf %9, %13 : vector<8x128xf32>
    %20 = math.exp %19 : vector<8x128xf32>
    %c0_9 = arith.constant 0 : index
    %c0_10 = arith.constant 0 : index
    %21 = vector.load %arg6[%c0_9, %c0_10] : memref<8x128xf32, #tpu.memory_space<vmem>>, vector<8x128xf32>
    %22 = arith.mulf %20, %21 : vector<8x128xf32>
    %cst_11 = arith.constant dense<0.000000e+00> : vector<8xf32>
    %23 = vector.multi_reduction <add>, %18, %cst_11 [1] : vector<8x8xf32> to vector<8xf32>
    %24 = vector.shape_cast %23 : vector<8xf32> to vector<8x1xf32>
    %25 = vector.broadcast %24 : vector<8x1xf32> to vector<8x128xf32>
    %26 = arith.addf %22, %25 : vector<8x128xf32>
    %c0_12 = arith.constant 0 : index
    %c0_13 = arith.constant 0 : index
    %27 = vector.load %arg6[%c0_12, %c0_13] : memref<8x128xf32, #tpu.memory_space<vmem>>, vector<8x128xf32>
    tpu.vector_store %arg6[%c0_12, %c0_13], %26 {strides = array<i32>} : memref<8x128xf32, #tpu.memory_space<vmem>>, vector<8x128xf32>,
    %c0_14 = arith.constant 0 : index
    %c0_15 = arith.constant 0 : index
    %28 = vector.load %arg5[%c0_14, %c0_15] : memref<8x128xf32, #tpu.memory_space<vmem>>, vector<8x128xf32>
    tpu.vector_store %arg5[%c0_14, %c0_15], %13 {strides = array<i32>} : memref<8x128xf32, #tpu.memory_space<vmem>>, vector<8x128xf32>,
    %c0_i32_16 = arith.constant 0 : i32
    %29 = arith.cmpi eq, %arg1, %c0_i32_16 : i32
    %30 = arith.extui %29 : i1 to i32
    %c0_i32_17 = arith.constant 0 : i32
    %31 = arith.cmpi ne, %30, %c0_i32_17 : i32
    scf.if %31 {
      %c0_18 = arith.constant 0 : index
      %c0_19 = arith.constant 0 : index
      %32 = vector.load %arg5[%c0_18, %c0_19] : memref<8x128xf32, #tpu.memory_space<vmem>>, vector<8x128xf32>
      %c0_20 = arith.constant 0 : index
      %c0_21 = arith.constant 0 : index
      %33 = vector.load %arg6[%c0_20, %c0_21] : memref<8x128xf32, #tpu.memory_space<vmem>>, vector<8x128xf32>
      %34 = math.log %33 : vector<8x128xf32>
      %35 = arith.addf %32, %34 : vector<8x128xf32>
      %c0_22 = arith.constant 0 : index
      %c0_23 = arith.constant 0 : index
      %36 = vector.load %arg7[%c0_22, %c0_23] : memref<8x128xf32, #tpu.memory_space<vmem>>, vector<8x128xf32>
      %37 = arith.subf %35, %36 : vector<8x128xf32>
      %c0_24 = arith.constant 0 : index
      %c0_25 = arith.constant 0 : index
      %38 = vector.load %arg4[%c0_24, %c0_25] : memref<8x128xf32, #tpu.memory_space<vmem>>, vector<8x128xf32>
      tpu.vector_store %arg4[%c0_24, %c0_25], %37 {strides = array<i32>} : memref<8x128xf32, #tpu.memory_space<vmem>>, vector<8x128xf32>,
    } else {
    }
    return
  }
  func.func @transform_0(%arg0: i32, %arg1: i32) -> (i32, i32) {
    %c0_i32 = arith.constant 0 : i32
    %c0_i32_0 = arith.constant 0 : i32
    return %arg0, %c0_i32 : i32, i32
  }
  func.func @transform_1(%arg0: i32, %arg1: i32) -> (i32, i32) {
    %c0_i32 = arith.constant 0 : i32
    %c0_i32_0 = arith.constant 0 : i32
    return %arg1, %c0_i32 : i32, i32
  }
  func.func @transform_2(%arg0: i32, %arg1: i32) -> (i32, i32) {
    %c0_i32 = arith.constant 0 : i32
    %c0_i32_0 = arith.constant 0 : i32
    return %arg0, %c0_i32 : i32, i32
  }
}

</mosaic_0001>

<bundles_post_ra>
// kernel: tpu_custom_call.1
= control target key start
LH: loop header
LB: loop body
LE: loop exit
PB: predicated region body
PF: predicated region fallthrough
CT: control target
= control target key end

     0   :  { %7 = vsyncpa [#allocation6], 0  ;;  %s327_s0 = inlined_call_operand.hbm [shape: f32[8,128], index: 0, kind: input, shape index: {}]   ;;  %s328_s1 = inlined_call_operand.hbm [shape: f32[8,128], index: 1, kind: input, shape index: {}]   ;;  %s329_s2 = inlined_call_operand.hbm [shape: f32[8,128], index: 2, kind: output, shape index: {}]  }
   0x1   :  { %8 = vsyncpa [#allocation9], 0 }
   0x2   :  { %9 = vsyncpa [#allocation7], 0  ;;  %s268_s9 = smov [#allocation5]   ;;  %s269_s11 = smov [#allocation8]  }
   0x3   :  { %s16_s10 = sshll.u32 %s268_s9, 4  ;;  %s26_s12 = sshll.u32 %s269_s11, 4  ;;  %s17_s10 = int_to_ptr.vmem [resolvable:$true] %s16_s10  ;;  %s27_s12 = int_to_ptr.vmem [resolvable:$true] %s26_s12 }
   0x4   :  { %s196_s15 = scalar_lea.hbm %s327_s0, 128 }
   0x5   :  { %p197_p0 = scmp.ne.s32.totalorder %s327_s0, %s196_s15  ;;  %p200_p1 = scmp.lt.u32.totalorder %s196_s15, %s327_s0 }
   0x7   :  { %p202_p2 = pnand %p200_p1, %p197_p0 }
   0x9   :  { %205 = shalt.err (!%p202_p2)
}
   0xa   :  { %s206_s20 = scalar_lea.vmem %s17_s10, 128  ;;  %p211_p4 = scmp.lt.s32.totalorder %s17_s10, %s17_s10 }
   0xb   :  { %p207_p3 = scmp.ne.s32.totalorder %s17_s10, %s206_s20  ;;  %p212_p5 = scmp.lt.s32.totalorder %s206_s20, %s206_s20 }
   0xd   :  { %p213_p6 = por %p212_p5, %p211_p4 }
   0xf   :  { %p214_p7 = pnand %p213_p6, %p207_p3 }
  0x11   :  { %217 = shalt.err (!%p214_p7)
}
  0x12   :  { %19 = dma.hbm_to_vmem [thread:$0]  %s327_s0, 128, %s17_s10, [#allocation6]  }
  0x13   :  { %s218_s25 = scalar_lea.hbm %s328_s1, 128 }
  0x14   :  { %p219_p8 = scmp.ne.s32.totalorder %s328_s1, %s218_s25  ;;  %p222_p9 = scmp.lt.u32.totalorder %s218_s25, %s328_s1 }
  0x16   :  { %p224_p10 = pnand %p222_p9, %p219_p8 }
  0x18   :  { %227 = shalt.err (!%p224_p10)
}
  0x19   :  { %s228_s30 = scalar_lea.vmem %s27_s12, 128  ;;  %p233_p12 = scmp.lt.s32.totalorder %s27_s12, %s27_s12 }
  0x1a   :  { %p229_p11 = scmp.ne.s32.totalorder %s27_s12, %s228_s30  ;;  %p234_p13 = scmp.lt.s32.totalorder %s228_s30, %s228_s30 }
  0x1c   :  { %p235_p0 = por %p234_p13, %p233_p12 }
  0x1e   :  { %p236_p1 = pnand %p235_p0, %p229_p11 }
  0x20   :  { %239 = shalt.err (!%p236_p1)
}
  0x21   :  { %29 = dma.hbm_to_vmem [thread:$0]  %s328_s1, 128, %s27_s12, [#allocation9]  }
  0x22   :  { %262 = dma.done.wait [#allocation6], 128  }
  0x23   :  { %263 = vsyncadd [#allocation6], 4294967168 }
  0x24   :  { %264 = dma.done.wait [#allocation9], 128  }
  0x25   :  { %265 = vsyncadd [#allocation9], 4294967168  ;;  %v270_v0 = vmov 0.0   ;;  %vm271_vm0 = vmmov 0   ;;  %v43_v1 = vld [vmem:[#allocation8] sm:$0xff]  ;;  %v42_v2 = vld [vmem:[#allocation5] sm:$0xff]  ;;  %v118_v10 = vlaneseq }
  0x26   :  { %180 = vmatprep.subr.mxu0 %v270_v0  ;;  %182 = vmatprep.mubr.msk.f32.mxu0 %vm271_vm0, %v270_v0  ;;  %vm124_vm1 = vcmask 64512   ;;  %s272_s1 = smov [#allocation10]  }
  0x27   :  { %181 = vmatpush3.xpose.msra.mxu0 %v43_v1  ;;  %v119_v11 = vshrl.u32 %v118_v10, 7  ;;  %v121_v12 = vand.u32 127, %v118_v10  ;;  %s168_s4 = sshll.u32 %s272_s1, 4  ;;  %s169_s4 = int_to_ptr.vmem [resolvable:$true] %s168_s4 }
  0x28   :  { %s240_s5 = scalar_lea.vmem %s169_s4, 128  ;;  %p245_p3 = scmp.lt.s32.totalorder %s169_s4, %s169_s4 }
  0x29   :  { %vm122_vm2 = vcmp.eq.s32.totalorder %v119_v11, %v121_v12  ;;  %p241_p2 = scmp.ne.s32.totalorder %s169_s4, %s240_s5  ;;  %p246_p4 = scmp.lt.s32.totalorder %s240_s5, %s240_s5 }
  0x2a   :  { %183 = vmatmul.mubr.f32.vlgmr.msra.gmra.mrb[0].mxu0 %v42_v2 }
  0x2b   :  { %p247_p5 = por %p246_p4, %p245_p3 }
  0x2d   :  { %p248_p6 = pnand %p247_p5, %p241_p2 }
  0xfd   :  { %v110_v3 = vpop.f32.mrb[0].mxu0 }
  0xfe   :  { %v184_v4 = vpop.f32.mrb[1].mxu0  ;;  %v131_v5 = vsel %vm124_vm1, %v110_v3, -inf  ;;  %v123_v15 = vsel %vm122_vm2, %v110_v3, 0.0 }
  0xff   :  { %132 = vmax.xlane.f32.xlu0 %v131_v5  ;;  %v125_v16 = vsel %vm124_vm1, %v123_v15, 0.0 }
 0x18c   :  { %v133_v6 = vpop.xlane.xlu0 %132 }
 0x18d   :  { %135 = vmax.xlane.f32.xlu0 %v133_v6  ;;  %v140_v17 = vsub.f32 -inf, %v133_v6 }
 0x18f   :  { %v141_v18 = vmul.f32 1.442695, %v140_v17 }
 0x21a   :  { %v136_v7 = vpop.xlane.xlu0 %135 }
 0x21b   :  { %v137_v8 = vsub.f32 %v110_v3, %v136_v7 }
 0x21d   :  { %v138_v9 = vmul.f32 1.442695, %v137_v8 }
 0x21f   :  { %190 = vpow2.f32 %v138_v9 }
 0x220   :  { %192 = vpow2.f32 %v141_v18 }
 0x229   :  { %v191_v13 = vpop.eup %190 }
 0x22a   :  { %v145_v14 = vsel %vm124_vm1, %v191_v13, 0.0  ;;  %v193_v19 = vpop.eup %192 }
 0x22b   :  { %146 = vadd.xlane.f32.xlu1 %v145_v14  ;;  %v144_v20 = vmul.f32 0.0, %v193_v19 }
 0x22f   :  { %126 = vadd.xlane.f32.xlu1 %v125_v16 }
 0x2b8   :  { %v147_v21 = vpop.xlane.xlu1 %146 }
 0x2b9   :  { %v148_v22 = vadd.f32 %v147_v21, %v144_v20 }
 0x2bb   :  { %194 = vlog2.f32 %v148_v22 }
 0x2bc   :  { %v127_v26 = vpop.xlane.xlu1 %126 }
 0x2c5   :  { %v195_v23 = vpop.eup %194 }
 0x2c6   :  { %v157_v24 = vmul.f32 0.6931472, %v195_v23 }
 0x2c8   :  { %v158_v25 = vadd.f32 %v157_v24, %v133_v6 }
 0x2ca   :  { %v160_v27 = vsub.f32 %v158_v25, %v127_v26 }
 0x2cc   :  { %161 = vst [vmem:[#allocation10] sm:$0xff] %v160_v27 }
 0x2cd   :  { %251 = shalt.err (!%p248_p6)
}
 0x2ce   :  { %s252_s8 = scalar_lea.hbm %s329_s2, 128 }
 0x2cf   :  { %p253_p7 = scmp.ne.s32.totalorder %s329_s2, %s252_s8  ;;  %p256_p8 = scmp.lt.u32.totalorder %s252_s8, %s329_s2 }
 0x2d1   :  { %p258_p9 = pnand %p256_p8, %p253_p7 }
 0x2d3   :  { %261 = shalt.err (!%p258_p9)
}
 0x2d4   :  { %171 = dma.vmem_to_hbm [thread:$0]  %s169_s4, 128, %s329_s2, [#allocation7]  }
 0x2d5   :  { %266 = dma.done.wait [#allocation7], 128  }
 0x2d6   :  { %267 = vsyncadd [#allocation7], 4294967168 }
 0x2d7   :  { %175 = vsyncpa [#allocation6], 1 }
 0x2d8   :  { %176 = vsyncpa [#allocation9], 1 }
 0x2d9   :  { %177 = vsyncpa [#allocation7], 1 }

</bundles_post_ra>
